<compile_context>
chip_gen: v5e
topology: v5e:2x2
jax: 0.10.0
libtpu: 0.0.40
codegen_flags: <defaults>
</compile_context>

<pallas_src>
import functools

import jax
import jax.numpy as jnp
from jax.experimental import pallas as pl
from jax.experimental.pallas import tpu as pltpu


# --------------------------------------------------------------------------- #
# Kernels
# --------------------------------------------------------------------------- #
def _duelling_single_tile_kernel(x_ref, w1_ref, b1_ref, w2_ref, b2_ref,
                                 wh_ref, bh_ref, out_ref, *, inv_count):
    """Whole batch in one tile: full forward incl. global adv.mean() epilogue."""
    # ---- layer 1: bf16 operands on the MXU, f32 accumulate, f32 elementwise ----
    h1 = jnp.dot(x_ref[...], w1_ref[...], preferred_element_type=jnp.float32)
    h1 = jnp.maximum(h1 + b1_ref[...], 0.0)

    # ---- layer 2 ----
    h2 = jnp.dot(h1.astype(w2_ref.dtype), w2_ref[...],
                 preferred_element_type=jnp.float32)
    h2 = jnp.maximum(h2 + b2_ref[...], 0.0)

    # ---- fused value|advantage head: one [H2, 1+A] matmul ----
    head = (jnp.dot(h2.astype(wh_ref.dtype), wh_ref[...],
                    preferred_element_type=jnp.float32) + bh_ref[...])
    val = head[:, :1]                                    # [B, 1]
    adv = head[:, 1:]                                    # [B, A]

    # Global mean over batch AND actions; reciprocal is a compile-time constant.
    adv_mean = jnp.sum(adv) * inv_count
    out_ref[...] = val + (adv - adv_mean)


def _duelling_head_kernel(x_ref, w1_ref, b1_ref, w2_ref, b2_ref,
                          wh_ref, bh_ref, head_ref):
    """Tiled path: stream the fused [val | adv] head per batch tile."""
    h1 = jnp.dot(x_ref[...], w1_ref[...], preferred_element_type=jnp.float32)
    h1 = jnp.maximum(h1 + b1_ref[...], 0.0)

    h2 = jnp.dot(h1.astype(w2_ref.dtype), w2_ref[...],
                 preferred_element_type=jnp.float32)
    h2 = jnp.maximum(h2 + b2_ref[...], 0.0)

    head_ref[...] = (jnp.dot(h2.astype(wh_ref.dtype), wh_ref[...],
                             preferred_element_type=jnp.float32)
                     + bh_ref[...])


# --------------------------------------------------------------------------- #
# Wrapper
# --------------------------------------------------------------------------- #
_MAX_SINGLE_TILE_ROWS = 2048


def _pick_block_b(batch):
    if batch <= _MAX_SINGLE_TILE_ROWS:
        return batch                                     # single-tile fast path
    for cand in (2048, 1024, 512, 256, 128, 64, 32, 16, 8):
        if batch % cand == 0:
            return cand
    return batch                                         # odd huge batch: one big tile


def duelling_q_forward(state, params, *, block_b=None):
    """Duelling-Q forward pass; Pallas kernel + (for the tiled path) a tiny
    fused XLA epilogue for the batch-global advantage mean."""
    w1, b1, w2, b2, wv, bv, wa, ba = params
    batch, state_size = state.shape
    action_size = wa.shape[1]

    # Head fusion (host side): [H2,1] | [H2,A] -> [H2, 1+A]; same for biases.
    w_head = jnp.concatenate([wv, wa], axis=1)
    b_head = jnp.concatenate([bv, ba], axis=1)

    # bf16 MXU operands (native on v6e/v7x); biases/elementwise stay f32.
    x_bf = state.astype(jnp.bfloat16)
    w1_bf = w1.astype(jnp.bfloat16)
    w2_bf = w2.astype(jnp.bfloat16)
    wh_bf = w_head.astype(jnp.bfloat16)

    if block_b is None:
        block_b = _pick_block_b(batch)

    # Tiny weights/biases stay resident in VMEM across the grid.
    resident = lambda a: pl.BlockSpec(a.shape, lambda i: (0, 0))
    weight_args = (w1_bf, b1, w2_bf, b2, wh_bf, b_head)
    weight_specs = [resident(a) for a in weight_args]

    if block_b >= batch:
        # -------- single-tile fast path: grid=(1,), everything in-kernel -------
        inv_count = 1.0 / float(batch * action_size)
        kernel = functools.partial(_duelling_single_tile_kernel,
                                   inv_count=inv_count)
        grid_spec = pltpu.PrefetchScalarGridSpec(
            num_scalar_prefetch=0,
            grid=(1,),
            in_specs=[pl.BlockSpec((batch, state_size), lambda i: (0, 0))]
                     + weight_specs,
            out_specs=pl.BlockSpec((batch, action_size), lambda i: (0, 0)),
        )
        return pl.pallas_call(
            kernel,
            out_shape=jax.ShapeDtypeStruct((batch, action_size), jnp.float32),
            grid_spec=grid_spec,
            compiler_params=pltpu.CompilerParams(
                dimension_semantics=("arbitrary",)),
        )(x_bf, *weight_args)

    # ------------------------------ tiled path ------------------------------ #
    assert batch % block_b == 0, "batch must be divisible by block_b"
    assert block_b % 8 == 0, "batch tile must be sublane-aligned"
    num_tiles = batch // block_b
    head_width = 1 + action_size

    grid_spec = pltpu.PrefetchScalarGridSpec(
        num_scalar_prefetch=0,
        grid=(num_tiles,),
        in_specs=[pl.BlockSpec((block_b, state_size), lambda i: (i, 0))]
                 + weight_specs,
        # Per-tile streaming output -> written back to HBM under the pipeline;
        # no cross-tile coupling, so the batch axis is truly parallel.
        out_specs=pl.BlockSpec((block_b, head_width), lambda i: (i, 0)),
    )
    head = pl.pallas_call(
        _duelling_head_kernel,
        out_shape=jax.ShapeDtypeStruct((batch, head_width), jnp.float32),
        grid_spec=grid_spec,
        compiler_params=pltpu.CompilerParams(
            dimension_semantics=("parallel",)),   # both TCs on v7x
    )(x_bf, *weight_args)

    # Duelling epilogue (global mean over batch AND actions) as one fused XLA op.
    val = head[:, :1]
    adv = head[:, 1:]
    return val + (adv - jnp.mean(adv))


# --------------------------------------------------------------------------- #
# Init + references
# --------------------------------------------------------------------------- #
def init_linear(key, in_features, out_features):
    """Deterministic init mimicking nn.Linear's default U(-1/sqrt(fan_in), +)."""
    kw, kb = jax.random.split(key)
    bound = 1.0 / jnp.sqrt(jnp.float32(in_features))
    # Stored as [in, out] so the kernel does x @ W.
    w = jax.random.uniform(kw, (in_features, out_features), jnp.float32,
                           minval=-bound, maxval=bound)
    b = jax.random.uniform(kb, (1, out_features), jnp.float32,
                           minval=-bound, maxval=bound)
    return w, b


def reference_forward_f32(state, params):
    """Pure-f32 JAX reference (original module semantics)."""
    w1, b1, w2, b2, wv, bv, wa, ba = params
    h1 = jax.nn.relu(state @ w1 + b1)
    h2 = jax.nn.relu(h1 @ w2 + b2)
    val = h2 @ wv + bv
    adv = h2 @ wa + ba
    return val + (adv - jnp.mean(adv))


def reference_forward_matched(state, params):
    """JAX reference with the same bf16-operand / f32-accumulate casts as the kernel."""
    w1, b1, w2, b2, wv, bv, wa, ba = params
    bf = jnp.bfloat16
    dot = lambda a, b: jnp.dot(a.astype(bf), b.astype(bf),
                               preferred_element_type=jnp.float32)
    h1 = jax.nn.relu(dot(state, w1) + b1)
    h2 = jax.nn.relu(dot(h1, w2) + b2)
    w_head = jnp.concatenate([wv, wa], axis=1)
    b_head = jnp.concatenate([bv, ba], axis=1)
    head = dot(h2, w_head) + b_head
    val, adv = head[:, :1], head[:, 1:]
    return val + (adv - jnp.mean(adv))


# --------------------------------------------------------------------------- #
# Demo / correctness check
# --------------------------------------------------------------------------- #
if __name__ == "__main__":
    batch = 32
    state_size = 16
    fc1_units = 64
    fc2_units = 32
    action_size = 4

    key = jax.random.PRNGKey(0)
    k_in, k_in2, k1, k2, k3, k4 = jax.random.split(key, 6)

    state = jax.random.normal(k_in, (batch, state_size), jnp.float32)

    w1, b1 = init_linear(k1, state_size, fc1_units)
    w2, b2 = init_linear(k2, fc1_units, fc2_units)
    wv, bv = init_linear(k3, fc2_units, 1)
    wa, ba = init_linear(k4, fc2_units, action_size)
    params = (w1, b1, w2, b2, wv, bv, wa, ba)

    # 1) Default path: whole batch in one tile -> grid=(1,) fast path.
    out = jax.block_until_ready(duelling_q_forward(state, params))
    assert out.shape == (batch, action_size)
    assert jnp.allclose(out, reference_forward_matched(state, params),
                        atol=1e-4, rtol=1e-4), \
        "single-tile: mismatch vs matched-precision reference"
    assert jnp.allclose(out, reference_forward_f32(state, params),
                        atol=5e-2, rtol=5e-2), \
        "single-tile: mismatch vs f32 reference (beyond bf16 tolerance)"

    # 2) Tiled/streaming path (small tile used purely as a correctness check
    #    of the multi-tile code path; the default would pick one tile here).
    state2 = jax.random.normal(k_in2, (64, state_size), jnp.float32)
    out2 = jax.block_until_ready(duelling_q_forward(state2, params, block_b=16))
    assert out2.shape == (64, action_size)
    assert jnp.allclose(out2, reference_forward_matched(state2, params),
                        atol=1e-4, rtol=1e-4), \
        "tiled: mismatch vs matched-precision reference"
    assert jnp.allclose(out2, reference_forward_f32(state2, params),
                        atol=5e-2, rtol=5e-2), \
        "tiled: mismatch vs f32 reference (beyond bf16 tolerance)"

    print("KERNEL_OK")
</pallas_src>

<mosaic_0001>
module attributes {stable_mosaic.version = 11 : i64} {
  func.func @_duelling_single_tile_kernel(%arg0: i32, %arg1: memref<32x16xbf16, #tpu.memory_space<vmem>>, %arg2: memref<16x64xbf16, #tpu.memory_space<vmem>>, %arg3: memref<1x64xf32, #tpu.memory_space<vmem>>, %arg4: memref<64x32xbf16, #tpu.memory_space<vmem>>, %arg5: memref<1x32xf32, #tpu.memory_space<vmem>>, %arg6: memref<32x5xbf16, #tpu.memory_space<vmem>>, %arg7: memref<1x5xf32, #tpu.memory_space<vmem>>, %arg8: memref<32x4xf32, #tpu.memory_space<vmem>>) attributes {dimension_semantics = [#tpu.dimension_semantics<arbitrary>], iteration_bounds = array<i64: 1>, scalar_prefetch = 0 : i64, scratch_operands = 0 : i64, tpu.core_type = #tpu.core_type<tc>, window_params = [{pipeline_mode = #tpu.pipeline_mode<synchronous>, transform_indices = @transform_0, window_bounds = array<i64: 32, 16>}, {pipeline_mode = #tpu.pipeline_mode<synchronous>, transform_indices = @transform_1, window_bounds = array<i64: 16, 64>}, {pipeline_mode = #tpu.pipeline_mode<synchronous>, transform_indices = @transform_2, window_bounds = array<i64: 1, 64>}, {pipeline_mode = #tpu.pipeline_mode<synchronous>, transform_indices = @transform_3, window_bounds = array<i64: 64, 32>}, {pipeline_mode = #tpu.pipeline_mode<synchronous>, transform_indices = @transform_4, window_bounds = array<i64: 1, 32>}, {pipeline_mode = #tpu.pipeline_mode<synchronous>, transform_indices = @transform_5, window_bounds = array<i64: 32, 5>}, {pipeline_mode = #tpu.pipeline_mode<synchronous>, transform_indices = @transform_6, window_bounds = array<i64: 1, 5>}, {pipeline_mode = #tpu.pipeline_mode<synchronous>, transform_indices = @transform_7, window_bounds = array<i64: 32, 4>}]} {
    %c0 = arith.constant 0 : index
    %c0_0 = arith.constant 0 : index
    %0 = vector.load %arg1[%c0, %c0_0] : memref<32x16xbf16, #tpu.memory_space<vmem>>, vector<32x16xbf16>
    %c0_1 = arith.constant 0 : index
    %c0_2 = arith.constant 0 : index
    %1 = vector.load %arg2[%c0_1, %c0_2] : memref<16x64xbf16, #tpu.memory_space<vmem>>, vector<16x64xbf16>
    %cst = arith.constant dense<0.000000e+00> : vector<32x64xf32>
    %2 = tpu.matmul %0, %1, %cst {dimension_numbers = #tpu.dot_dimension_numbers<[1], [0], [0], [1], [0, 0, 1, 1], [], []>} : vector<32x16xbf16>, vector<16x64xbf16>, vector<32x64xf32> -> vector<32x64xf32>
    %c0_3 = arith.constant 0 : index
    %c0_4 = arith.constant 0 : index
    %3 = vector.load %arg3[%c0_3, %c0_4] : memref<1x64xf32, #tpu.memory_space<vmem>>, vector<1x64xf32>
    %4 = vector.broadcast %3 : vector<1x64xf32> to vector<32x64xf32>
    %5 = arith.addf %2, %4 : vector<32x64xf32>
    %cst_5 = arith.constant 0.000000e+00 : f32
    %6 = vector.broadcast %cst_5 : f32 to vector<32x64xf32>
    %7 = arith.maximumf %5, %6 : vector<32x64xf32>
    %8 = arith.truncf %7 : vector<32x64xf32> to vector<32x64xbf16>
    %c0_6 = arith.constant 0 : index
    %c0_7 = arith.constant 0 : index
    %9 = vector.load %arg4[%c0_6, %c0_7] : memref<64x32xbf16, #tpu.memory_space<vmem>>, vector<64x32xbf16>
    %cst_8 = arith.constant dense<0.000000e+00> : vector<32x32xf32>
    %10 = tpu.matmul %8, %9, %cst_8 {dimension_numbers = #tpu.dot_dimension_numbers<[1], [0], [0], [1], [0, 0, 1, 1], [], []>} : vector<32x64xbf16>, vector<64x32xbf16>, vector<32x32xf32> -> vector<32x32xf32>
    %c0_9 = arith.constant 0 : index
    %c0_10 = arith.constant 0 : index
    %11 = vector.load %arg5[%c0_9, %c0_10] : memref<1x32xf32, #tpu.memory_space<vmem>>, vector<1x32xf32>
    %12 = vector.broadcast %11 : vector<1x32xf32> to vector<32x32xf32>
    %13 = arith.addf %10, %12 : vector<32x32xf32>
    %cst_11 = arith.constant 0.000000e+00 : f32
    %14 = vector.broadcast %cst_11 : f32 to vector<32x32xf32>
    %15 = arith.maximumf %13, %14 : vector<32x32xf32>
    %16 = arith.truncf %15 : vector<32x32xf32> to vector<32x32xbf16>
    %c0_12 = arith.constant 0 : index
    %c0_13 = arith.constant 0 : index
    %17 = vector.load %arg6[%c0_12, %c0_13] : memref<32x5xbf16, #tpu.memory_space<vmem>>, vector<32x5xbf16>
    %cst_14 = arith.constant dense<0.000000e+00> : vector<32x5xf32>
    %18 = tpu.matmul %16, %17, %cst_14 {dimension_numbers = #tpu.dot_dimension_numbers<[1], [0], [0], [1], [0, 0, 1, 1], [], []>} : vector<32x32xbf16>, vector<32x5xbf16>, vector<32x5xf32> -> vector<32x5xf32>
    %c0_15 = arith.constant 0 : index
    %c0_16 = arith.constant 0 : index
    %19 = vector.load %arg7[%c0_15, %c0_16] : memref<1x5xf32, #tpu.memory_space<vmem>>, vector<1x5xf32>
    %20 = vector.broadcast %19 : vector<1x5xf32> to vector<32x5xf32>
    %21 = arith.addf %18, %20 : vector<32x5xf32>
    %22 = vector.extract_strided_slice %21 {offsets = [0, 0], sizes = [32, 1], strides = [1, 1]} : vector<32x5xf32> to vector<32x1xf32>
    %23 = vector.extract_strided_slice %21 {offsets = [0, 1], sizes = [32, 4], strides = [1, 1]} : vector<32x5xf32> to vector<32x4xf32>
    %24 = vector.shape_cast %23 : vector<32x4xf32> to vector<1x32x4xf32>
    %cst_17 = arith.constant dense<0.000000e+00> : vector<1xf32>
    %25 = vector.multi_reduction <add>, %24, %cst_17 [1, 2] : vector<1x32x4xf32> to vector<1xf32>
    %26 = vector.shape_cast %25 : vector<1xf32> to vector<1x1x1xf32>
    %27 = vector.extract %26[0, 0, 0] : f32 from vector<1x1x1xf32>
    %cst_18 = arith.constant 7.812500e-03 : f32
    %28 = arith.mulf %27, %cst_18 : f32
    %29 = vector.broadcast %28 : f32 to vector<32x4xf32>
    %30 = arith.subf %23, %29 : vector<32x4xf32>
    %31 = vector.broadcast %22 : vector<32x1xf32> to vector<32x4xf32>
    %32 = arith.addf %31, %30 : vector<32x4xf32>
    %c0_19 = arith.constant 0 : index
    %c0_20 = arith.constant 0 : index
    %33 = vector.load %arg8[%c0_19, %c0_20] : memref<32x4xf32, #tpu.memory_space<vmem>>, vector<32x4xf32>
    tpu.vector_store %arg8[%c0_19, %c0_20], %32 {strides = array<i32>} : memref<32x4xf32, #tpu.memory_space<vmem>>, vector<32x4xf32>,
    return
  }
  func.func @transform_0(%arg0: i32) -> (i32, i32) {
    %c0_i32 = arith.constant 0 : i32
    %c0_i32_0 = arith.constant 0 : i32
    %c0_i32_1 = arith.constant 0 : i32
    return %c0_i32, %c0_i32_0 : i32, i32
  }
  func.func @transform_1(%arg0: i32) -> (i32, i32) {
    %c0_i32 = arith.constant 0 : i32
    %c0_i32_0 = arith.constant 0 : i32
    %c0_i32_1 = arith.constant 0 : i32
    return %c0_i32, %c0_i32_0 : i32, i32
  }
  func.func @transform_2(%arg0: i32) -> (i32, i32) {
    %c0_i32 = arith.constant 0 : i32
    %c0_i32_0 = arith.constant 0 : i32
    %c0_i32_1 = arith.constant 0 : i32
    return %c0_i32, %c0_i32_0 : i32, i32
  }
  func.func @transform_3(%arg0: i32) -> (i32, i32) {
    %c0_i32 = arith.constant 0 : i32
    %c0_i32_0 = arith.constant 0 : i32
    %c0_i32_1 = arith.constant 0 : i32
    return %c0_i32, %c0_i32_0 : i32, i32
  }
  func.func @transform_4(%arg0: i32) -> (i32, i32) {
    %c0_i32 = arith.constant 0 : i32
    %c0_i32_0 = arith.constant 0 : i32
    %c0_i32_1 = arith.constant 0 : i32
    return %c0_i32, %c0_i32_0 : i32, i32
  }
  func.func @transform_5(%arg0: i32) -> (i32, i32) {
    %c0_i32 = arith.constant 0 : i32
    %c0_i32_0 = arith.constant 0 : i32
    %c0_i32_1 = arith.constant 0 : i32
    return %c0_i32, %c0_i32_0 : i32, i32
  }
  func.func @transform_6(%arg0: i32) -> (i32, i32) {
    %c0_i32 = arith.constant 0 : i32
    %c0_i32_0 = arith.constant 0 : i32
    %c0_i32_1 = arith.constant 0 : i32
    return %c0_i32, %c0_i32_0 : i32, i32
  }
  func.func @transform_7(%arg0: i32) -> (i32, i32) {
    %c0_i32 = arith.constant 0 : i32
    %c0_i32_0 = arith.constant 0 : i32
    %c0_i32_1 = arith.constant 0 : i32
    return %c0_i32, %c0_i32_0 : i32, i32
  }
}

</mosaic_0001>

<bundles_post_ra>
// kernel: tpu_custom_call.1
= control target key start
LH: loop header
LB: loop body
LE: loop exit
PB: predicated region body
PF: predicated region fallthrough
CT: control target
= control target key end

     0   :  { %vm53_vm0 = vcmask 130048   ;;  %vm121_vm1 = vcmask 523264   ;;  %vm173_vm2 = vcmask 261120   ;;  %v347_v39 = vmov 0   ;;  %s348_s19 = smov 127   ;;  %s453_s1 = inlined_call_operand.vmem [shape: bf16[16,64], index: 1, kind: input, shape index: {}]   ;;  %s454_s0 = inlined_call_operand.vmem [shape: bf16[32,16], index: 0, kind: input, shape index: {}]   ;;  %s455_s2 = inlined_call_operand.vmem [shape: f32[1,64], index: 2, kind: input, shape index: {}]   ;;  %s456_s4 = inlined_call_operand.vmem [shape: f32[1,32], index: 4, kind: input, shape index: {}]   ;;  %s457_s3 = inlined_call_operand.vmem [shape: bf16[64,32], index: 3, kind: input, shape index: {}]   ;;  %s458_s6 = inlined_call_operand.vmem [shape: f32[1,5], index: 6, kind: input, shape index: {}]   ;;  %s459_s5 = inlined_call_operand.vmem [shape: bf16[32,5], index: 5, kind: input, shape index: {}]   ;;  %s460_s7 = inlined_call_operand.vmem [shape: f32[32,4], index: 7, kind: output, shape index: {}]  }
   0x1   :  { %v326_v0 = vld [vmem:[%s453_s1] sm:$0xff]  ;;  %v325_v2 = vld [vmem:[%s454_s0 + $0x8] sm:$0xff]  ;;  %v330_v3 = vld [vmem:[%s457_s3 + $0x18] sm:$0xff]  ;;  %342 = vset.pattern.permute.xlu0 %v347_v39  ;;  %343 = vset.pattern.permute.xlu1 %v347_v39  ;;  %vm215_vm3 = vcmask 31744  }
   0x2   :  { %v324_v1 = vld [vmem:[%s454_s0] sm:$0xff]  ;;  %67 = vmatpush.bf16.msra.mxu0 %v326_v0  ;;  %132 = vmatpush.bf16.msra.mxu1 %v330_v3  ;;  %v329_v4 = vld [vmem:[%s457_s3 + $0x10] sm:$0xff]  ;;  %v328_v5 = vld [vmem:[%s457_s3 + $0x8] sm:$0xff] }
   0x3   :  { %333 = vmatpush.bf16.msra.mxu3 %v330_v3  ;;  %v327_v6 = vld [vmem:[%s457_s3] sm:$0xff]  ;;  %v332_v22 = vld [vmem:[%s459_s5 + $0x8] sm:$0xff]  ;;  %341 = vset.pattern.permute.xlu2 %v347_v39 }
   0x4   :  { %v344_v8 = vld [vmem:[%s455_s2] ss:$0 sm:$0xff]  ;;  %186 = vmatpush.bf16.msra.mxu2 %v332_v22 }
   0x5   :  { %294 = vmatmul.msk.bf16.vlgmr.msra.gmra.mxu0 %vm53_vm0, %v324_v1  ;;  %v331_v23 = vld [vmem:[%s459_s5] sm:$0xff] }
   0x6   :  { %133 = vmatpush.bf16.msra.mxu1 %v329_v4  ;;  %v345_v25 = vld [vmem:[%s456_s4] ss:$0 sm:$0xff] }
   0x7   :  { %334 = vmatpush.bf16.msra.mxu3 %v329_v4  ;;  %v346_v40 = vld [vmem:[%s458_s6] ss:$0 sm:$0xff] }
   0x8   :  { %187 = vmatpush.bf16.msra.mxu2 %v331_v23 }
   0xa   :  { %134 = vmatpush.bf16.msra.mxu1 %v328_v5 }
   0xb   :  { %335 = vmatpush.bf16.msra.mxu3 %v328_v5 }
   0xe   :  { %135 = vmatpush.bf16.msra.mxu1 %v327_v6 }
   0xf   :  { %336 = vmatpush.bf16.msra.mxu3 %v327_v6 }
  0x15   :  { %295 = vmatmul.msk.bf16.gmra.mxu0 %vm53_vm0, %v325_v2 }
  0x82   :  { %v69_v7 = vpop.f32.mrf.mxu0 }
  0x83   :  { %v70_v9 = vadd.f32 %v344_v8, %v69_v7 }
  0x85   :  { %v79_v12 = vmax.f32 %v70_v9, 0.0 }
  0x8a   :  { %v71_v10 = vpop.f32.mrf.mxu0 }
  0x8b   :  { %v72_v11 = vadd.f32 %v344_v8, %v71_v10 }
  0x8d   :  { %v80_v13 = vmax.f32 %v72_v11, 0.0 }
  0x8f   :  { %v83_v14 = vpack.c.bf16 %v80_v13, %v79_v12 }
  0x91   :  { %312 = vmatmul.msk.bf16.vlgmr.msra.gmra.mxu1 %vm121_vm1, %v83_v14 }
  0x92   :  { %v74_v15 = vpop.f32.mrf.mxu0 }
  0x93   :  { %v75_v16 = vadd.f32 %v344_v8, %v74_v15 }
  0x95   :  { %v81_v19 = vmax.f32 %v75_v16, 0.0 }
  0x9a   :  { %v76_v17 = vpop.f32.mrf.mxu0 }
  0x9b   :  { %v77_v18 = vadd.f32 %v344_v8, %v76_v17 }
  0x9d   :  { %v82_v20 = vmax.f32 %v77_v18, 0.0 }
  0x9f   :  { %v84_v21 = vpack.c.bf16 %v82_v20, %v81_v19 }
  0xa1   :  { %313 = vmatmul.msk.bf16.vlgmr.msra.gmra.mxu3 %vm121_vm1, %v84_v21 }
 0x10e   :  { %v137_v24 = vpop.f32.mrf.mxu1 }
 0x10f   :  { %v138_v26 = vadd.f32 %v345_v25, %v137_v24 }
 0x111   :  { %v147_v29 = vmax.f32 %v138_v26, 0.0 }
 0x116   :  { %v139_v27 = vpop.f32.mrf.mxu1 }
 0x117   :  { %v140_v28 = vadd.f32 %v345_v25, %v139_v27 }
 0x119   :  { %v148_v30 = vmax.f32 %v140_v28, 0.0 }
 0x11b   :  { %v151_v31 = vpack.c.bf16 %v148_v30, %v147_v29 }
 0x11d   :  { %322 = vmatmul.msk.bf16.vlgmr.msra.gmra.mxu2 %vm173_vm2, %v151_v31 }
 0x124   :  { %v142_v32 = vpop.f32.mrf.mxu3 }
 0x125   :  { %v143_v33 = vadd.f32 %v345_v25, %v142_v32 }
 0x127   :  { %v149_v36 = vmax.f32 %v143_v33, 0.0 }
 0x12c   :  { %v144_v34 = vpop.f32.mrf.mxu3 }
 0x12d   :  { %v145_v35 = vadd.f32 %v345_v25, %v144_v34 }
 0x12f   :  { %v150_v37 = vmax.f32 %v145_v35, 0.0 }
 0x131   :  { %v152_v38 = vpack.c.bf16 %v150_v37, %v149_v36 }
 0x133   :  { %323 = vmatmul.msk.bf16.gmra.mxu2 %vm173_vm2, %v152_v38 }
 0x1a0   :  { %v189_v41 = vpop.f32.mrf.mxu2 }
 0x1a1   :  { %v190_v42 = vadd.f32 %v346_v40, %v189_v41 }
 0x1a3   :  { %203 = vrot.lane.b32.xlu0 %v190_v42, %s348_s19 }
 0x1a8   :  { %v191_v43 = vpop.f32.mrf.mxu2 }
 0x1a9   :  { %v192_v44 = vadd.f32 %v346_v40, %v191_v43 }
 0x1ab   :  { %205 = vrot.lane.b32.xlu0 %v192_v44, %s348_s19 }
 0x1b3   :  { %243 = vperm.xlu0 %342, %v192_v44  }
 0x1b6   :  { %v194_v45 = vpop.f32.mrf.mxu2 }
 0x1b7   :  { %v195_v46 = vadd.f32 %v346_v40, %v194_v45 }
 0x1b9   :  { %207 = vrot.lane.b32.xlu1 %v195_v46, %s348_s19 }
 0x1be   :  { %v196_v47 = vpop.f32.mrf.mxu2 }
 0x1bf   :  { %v197_v48 = vadd.f32 %v346_v40, %v196_v47 }
 0x1c1   :  { %209 = vrot.lane.b32.xlu1 %v197_v48, %s348_s19 }
 0x1c9   :  { %247 = vperm.xlu1 %343, %v195_v46  }
 0x1d1   :  { %251 = vperm.xlu1 %343, %v197_v48  }
 0x215   :  { %v204_v49 = vpop.permute.xlu0 %203 }
 0x216   :  { %v216_v53 = vsel %vm215_vm3, %v204_v49, 0.0 }
 0x21d   :  { %v206_v50 = vpop.permute.xlu0 %205 }
 0x21e   :  { %v217_v52 = vsel %vm215_vm3, %v206_v50, 0.0 }
 0x21f   :  { %v218_v55 = vadd.f32 %v217_v52, %v216_v53 }
 0x225   :  { %v244_v8 = vpop.permute.xlu0 %243 }
 0x22b   :  { %v208_v51 = vpop.permute.xlu1 %207 }
 0x22c   :  { %v219_v54 = vsel %vm215_vm3, %v208_v51, 0.0 }
 0x22d   :  { %v220_v56 = vadd.f32 %v219_v54, %v218_v55 }
 0x233   :  { %v210_v57 = vpop.permute.xlu1 %209 }
 0x234   :  { %v221_v58 = vsel %vm215_vm3, %v210_v57, 0.0 }
 0x235   :  { %v222_v59 = vadd.f32 %v221_v58, %v220_v56 }
 0x237   :  { %223 = vadd.xlane.f32.xlu2 %v222_v59 }
 0x23b   :  { %v248_v3 = vpop.permute.xlu1 %247 }
 0x243   :  { %v252_v14 = vpop.permute.xlu1 %251 }
 0x24f   :  { %239 = vperm.xlu2 %341, %v190_v42  }
 0x2aa   :  { %v224_v60 = vpop.xlane.xlu2 %223 }
 0x2ab   :  { %v225_v61 = vrot.slane %v224_v60, 4 }
 0x2ad   :  { %v226_v62 = vadd.f32 %v225_v61, %v224_v60 }
 0x2af   :  { %v227_v63 = vrot.slane %v226_v62, 2 }
 0x2b1   :  { %v228_v0 = vadd.f32 %v227_v63, %v226_v62 }
 0x2b2   :  { %v240_v9 = vpop.permute.xlu2 %239 }
 0x2b3   :  { %v229_v1 = vrot.slane %v228_v0, 1 }
 0x2b5   :  { %v230_v2 = vadd.f32 %v229_v1, %v228_v0 }
 0x2b7   :  { %337 = vpush %v230_v2 }
 0x2e8   :  { %s338_s6 = spop %337 }
 0x2e9   :  { %s232_s20 = smul.f32 0.0078125, %s338_s6 }
 0x2eb   :  { %v233_v4 = vstv %s232_s20 }
 0x2ec   :  { %v234_v5 = vsub.f32 %v190_v42, %v233_v4  ;;  %v235_v6 = vsub.f32 %v192_v44, %v233_v4  ;;  %v236_v7 = vsub.f32 %v195_v46, %v233_v4  ;;  %v237_v13 = vsub.f32 %v197_v48, %v233_v4 }
 0x2ee   :  { %v256_v10 = vadd.f32 %v248_v3, %v236_v7  ;;  %v254_v11 = vadd.f32 %v240_v9, %v234_v5  ;;  %v255_v12 = vadd.f32 %v244_v8, %v235_v6  ;;  %v257_v15 = vadd.f32 %v252_v14, %v237_v13 }
 0x2f0   :  { %266 = vrot.lane.b32.xlu2 %v256_v10, %s348_s19  ;;  %262 = vrot.lane.b32.xlu0 %v254_v11, %s348_s19 }
 0x2f1   :  { %264 = vrot.lane.b32.xlu1 %v255_v12, %s348_s19 }
 0x2f8   :  { %268 = vrot.lane.b32.xlu0 %v257_v15, %s348_s19 }
 0x34a   :  { %v267_v16 = vpop.permute.xlu2 %266 }
 0x34b   :  { %276 = vst.msk [vmem:[%s460_s7 + $0x10] sm:$0xff] %vm215_vm3, %v267_v16 }
 0x362   :  { %v263_v17 = vpop.permute.xlu0 %262 }
 0x363   :  { %v265_v18 = vpop.permute.xlu1 %264  ;;  %274 = vst.msk [vmem:[%s460_s7] sm:$0xff] %vm215_vm3, %v263_v17 }
 0x364   :  { %275 = vst.msk [vmem:[%s460_s7 + $0x8] sm:$0xff] %vm215_vm3, %v265_v18 }
 0x36a   :  { %v269_v19 = vpop.permute.xlu0 %268 }
 0x36b   :  { %277 = vst.msk [vmem:[%s460_s7 + $0x18] sm:$0xff] %vm215_vm3, %v269_v19 }

</bundles_post_ra>
